<compile_context>
chip_gen: v6e
topology: v6e:2x2x1
jax: 0.10.0
libtpu: 0.0.40
codegen_flags: <defaults>
</compile_context>

<pallas_src>
import functools

import jax
import jax.numpy as jnp
from jax.experimental import pallas as pl
from jax.experimental.pallas import tpu as pltpu


def _round_up(x: int, m: int) -> int:
    return ((x + m - 1) // m) * m


def _duo_loss_kernel(logits_ref, labels_ref, probs_ref, hinge_ref, *, margin):
    # logits_ref: [C, tb]  (candidates on sublanes, batch lane-dense)
    # labels_ref: [1, tb]  (+1 / -1 ranking targets, native dtype)
    x = logits_ref[...].astype(jnp.float32)                  # [C, tb]
    y = labels_ref[...].astype(jnp.float32)                  # [1, tb]
    c, tb = x.shape

    # --- softmax(logits, dim=-1)[:, 0] (only the positive column is kept) ----
    m = jnp.max(x, axis=0, keepdims=True)                    # [1, tb] sublane reduce
    e = jnp.exp(x - m)                                       # [C, tb]
    denom = jnp.sum(e, axis=0, keepdims=True)                # [1, tb]
    # approx=False: keep full f32 accuracy for the returned probabilities.
    prob0 = e[0:1, :] * pl.reciprocal(denom, approx=False)   # [1, tb]
    probs_ref[...] = prob0.astype(probs_ref.dtype)

    # --- fn(logits, labels, margin): margin-ranking hinge loss ---------------
    # Hinge over all C rows (aligned, pure VPU); the positive row (row 0) is
    # masked with a sublane iota instead of an offset-1 sublane slice.
    pos = x[0:1, :]                                          # [1, tb]
    hinge = jnp.maximum(0.0, -y * (pos - x) + margin)        # [C, tb]
    row = jax.lax.broadcasted_iota(jnp.int32, (c, tb), 0)
    hinge = jnp.where(row >= 1, hinge, 0.0)
    # Per-batch-element partial sums, lane-dense store; the tiny final
    # reduction (sum over B, divide by B*(C-1)) happens in the wrapper.
    hinge_ref[...] = jnp.sum(hinge, axis=0, keepdims=True)   # [1, tb] f32


def _choose_tb(b, c, logit_itemsize, label_itemsize):
    """Batch tile (lane axis) from a VMEM byte budget; >= 2 grid steps if B > 128."""
    if b <= 128:
        return b  # single block whose dims equal the full array dims
    cp = _round_up(c, 8)  # sublane padding of the candidate axis
    per_lane_bytes = (
        cp * logit_itemsize * 2    # double-buffered logits input blocks
        + cp * 4 * 3               # f32 in-kernel intermediates (x, e, hinge)
        + 8 * label_itemsize * 2   # double-buffered labels blocks (padded to 8 sublanes)
        + 8 * logit_itemsize * 2   # probs output blocks
        + 8 * 4 * 2                # hinge row-sum output blocks
    )
    budget = 4 * 1024 * 1024       # ~4 MiB / step: >=512 lanes of real payload per
                                   # step, well under the smallest scoped-VMEM default
    tb = max(128, (budget // per_lane_bytes) // 128 * 128)
    # >= 2 grid steps so the "parallel" batch axis can use both v7x TensorCores.
    tb = min(tb, max(128, _round_up(-(-b // 2), 128)))
    return int(min(tb, _round_up(b, 128)))


def duo_loss(logits, labels, *, margin=1.0):
    """Returns (softmax(logits, -1)[:, 0], loss, to_log) like duoLoss.forward."""
    b, c = logits.shape
    if c < 2:
        raise ValueError("duo_loss requires at least one negative candidate (C >= 2).")

    tb = _choose_tb(b, c, logits.dtype.itemsize, labels.dtype.itemsize)
    g = pl.cdiv(b, tb)

    # Lane-dense layout: candidates -> sublanes, batch -> 128-lane axis.  The
    # transpose is the only wrapper-side data movement; allow_input_fusion lets
    # XLA fuse it into the pallas operand instead of an extra HBM round-trip.
    # Labels keep their native dtype (pass bf16 / int8 {+1,-1} for less traffic).
    logits_t = jnp.transpose(logits)        # [C, B]
    labels_row = labels.reshape(1, b)       # [1, B] (free reshape, no relayout)

    probs_row, hinge_row = pl.pallas_call(
        functools.partial(_duo_loss_kernel, margin=float(margin)),
        grid=(g,),
        out_shape=(
            jax.ShapeDtypeStruct((1, b), logits.dtype),   # softmax(., -1)[:, 0]
            jax.ShapeDtypeStruct((1, b), jnp.float32),    # per-sample hinge sums
        ),
        in_specs=[
            pl.BlockSpec((c, tb), lambda i: (0, i)),
            pl.BlockSpec((1, tb), lambda i: (0, i)),
        ],
        out_specs=(
            pl.BlockSpec((1, tb), lambda i: (0, i)),
            pl.BlockSpec((1, tb), lambda i: (0, i)),
        ),
        compiler_params=pltpu.CompilerParams(
            dimension_semantics=("parallel",),
            allow_input_fusion=[True, True],
        ),
    )(logits_t, labels_row)

    probs0 = probs_row[0]                                        # [B]
    loss = jnp.sum(hinge_row[0]) / jnp.float32(b * (c - 1))      # global mean
    to_log = {"loss_no_reg": jax.lax.stop_gradient(loss)}
    return probs0, loss, to_log


def _reference(logits, labels, margin):
    probs0 = jax.nn.softmax(logits.astype(jnp.float32), axis=-1)[:, 0]
    diff = logits[:, 0:1].astype(jnp.float32) - logits[:, 1:].astype(jnp.float32)
    loss = jnp.mean(jnp.maximum(0.0, -labels[:, None].astype(jnp.float32) * diff + margin))
    return probs0, loss


if __name__ == "__main__":
    key = jax.random.PRNGKey(0)
    k1, k2, k3, k4 = jax.random.split(key, 4)

    # Case 1: canonical duo setting (1 positive + 1 negative), f32, tiny batch.
    B, C, margin = 8, 2, 1.0
    logits = jax.random.normal(k1, (B, C), dtype=jnp.float32)
    labels = jnp.where(jax.random.bernoulli(k2, 0.5, (B,)), 1.0, -1.0).astype(jnp.float32)

    probs0, loss, to_log = duo_loss(logits, labels, margin=margin)
    jax.block_until_ready((probs0, loss, to_log["loss_no_reg"]))

    ref_p, ref_l = _reference(logits, labels, margin)
    assert probs0.shape == (B,)
    assert jnp.allclose(probs0, ref_p, atol=1e-5), "probs mismatch (case 1)"
    assert jnp.allclose(loss, ref_l, atol=1e-5), "loss mismatch (case 1)"

    # Case 2: more negatives + batch not a multiple of the tile
    # (exercises the edge-block path and a 2-step "parallel" grid).
    B2, C2, margin2 = 300, 4, 0.5
    logits2 = jax.random.normal(k3, (B2, C2), dtype=jnp.float32)
    labels2 = jnp.where(jax.random.bernoulli(k4, 0.5, (B2,)), 1.0, -1.0).astype(jnp.float32)

    probs0_2, loss2, _ = duo_loss(logits2, labels2, margin=margin2)
    jax.block_until_ready((probs0_2, loss2))

    ref_p2, ref_l2 = _reference(logits2, labels2, margin2)
    assert jnp.allclose(probs0_2, ref_p2, atol=1e-5), "probs mismatch (case 2)"
    assert jnp.allclose(loss2, ref_l2, atol=1e-5), "loss mismatch (case 2)"

    print("KERNEL_OK")
</pallas_src>

<mosaic_0001>
module attributes {stable_mosaic.version = 11 : i64} {
  func.func @_duo_loss_kernel(%arg0: i32, %arg1: memref<2x8xf32, #tpu.memory_space<vmem>>, %arg2: memref<1x8xf32, #tpu.memory_space<vmem>>, %arg3: memref<1x8xf32, #tpu.memory_space<vmem>>, %arg4: memref<1x8xf32, #tpu.memory_space<vmem>>) attributes {dimension_semantics = [#tpu.dimension_semantics<parallel>], iteration_bounds = array<i64: 1>, scalar_prefetch = 0 : i64, scratch_operands = 0 : i64, tpu.core_type = #tpu.core_type<tc>, window_params = [{transform_indices = @transform_0, window_bounds = array<i64: 2, 8>}, {transform_indices = @transform_1, window_bounds = array<i64: 1, 8>}, {transform_indices = @transform_2, window_bounds = array<i64: 1, 8>}, {transform_indices = @transform_3, window_bounds = array<i64: 1, 8>}]} {
    %c0 = arith.constant 0 : index
    %c0_0 = arith.constant 0 : index
    %0 = vector.load %arg1[%c0, %c0_0] : memref<2x8xf32, #tpu.memory_space<vmem>>, vector<2x8xf32>
    %c0_1 = arith.constant 0 : index
    %c0_2 = arith.constant 0 : index
    %1 = vector.load %arg2[%c0_1, %c0_2] : memref<1x8xf32, #tpu.memory_space<vmem>>, vector<1x8xf32>
    %cst = arith.constant dense<0xFF800000> : vector<8xf32>
    %2 = vector.multi_reduction <maximumf>, %0, %cst [0] : vector<2x8xf32> to vector<8xf32>
    %3 = vector.shape_cast %2 : vector<8xf32> to vector<1x8xf32>
    %4 = vector.broadcast %3 : vector<1x8xf32> to vector<2x8xf32>
    %5 = arith.subf %0, %4 : vector<2x8xf32>
    %6 = math.exp %5 : vector<2x8xf32>
    %cst_3 = arith.constant dense<0.000000e+00> : vector<8xf32>
    %7 = vector.multi_reduction <add>, %6, %cst_3 [0] : vector<2x8xf32> to vector<8xf32>
    %8 = vector.shape_cast %7 : vector<8xf32> to vector<1x8xf32>
    %9 = vector.extract_strided_slice %6 {offsets = [0, 0], sizes = [1, 8], strides = [1, 1]} : vector<2x8xf32> to vector<1x8xf32>
    %10 = tpu.reciprocal %8 : vector<1x8xf32> -> vector<1x8xf32>
    %11 = arith.mulf %9, %10 : vector<1x8xf32>
    %c0_4 = arith.constant 0 : index
    %c0_5 = arith.constant 0 : index
    %12 = vector.load %arg3[%c0_4, %c0_5] : memref<1x8xf32, #tpu.memory_space<vmem>>, vector<1x8xf32>
    tpu.vector_store %arg3[%c0_4, %c0_5], %11 {strides = array<i32>} : memref<1x8xf32, #tpu.memory_space<vmem>>, vector<1x8xf32>,
    %13 = vector.extract_strided_slice %0 {offsets = [0, 0], sizes = [1, 8], strides = [1, 1]} : vector<2x8xf32> to vector<1x8xf32>
    %cst_6 = arith.constant 0.000000e+00 : f32
    %14 = vector.broadcast %cst_6 : f32 to vector<1x8xf32>
    %15 = arith.subf %14, %1 : vector<1x8xf32>
    %16 = vector.broadcast %13 : vector<1x8xf32> to vector<2x8xf32>
    %17 = arith.subf %16, %0 : vector<2x8xf32>
    %18 = vector.broadcast %15 : vector<1x8xf32> to vector<2x8xf32>
    %19 = arith.mulf %18, %17 : vector<2x8xf32>
    %cst_7 = arith.constant 1.000000e+00 : f32
    %20 = vector.broadcast %cst_7 : f32 to vector<2x8xf32>
    %21 = arith.addf %19, %20 : vector<2x8xf32>
    %cst_8 = arith.constant 0.000000e+00 : f32
    %22 = vector.broadcast %cst_8 : f32 to vector<2x8xf32>
    %23 = arith.maximumf %22, %21 : vector<2x8xf32>
    %24 = tpu.iota {dimensions = array<i32: 0>} : vector<2x8xi32>
    %c1_i32 = arith.constant 1 : i32
    %25 = vector.broadcast %c1_i32 : i32 to vector<2x8xi32>
    %26 = arith.cmpi sge, %24, %25 : vector<2x8xi32>
    %cst_9 = arith.constant 0.000000e+00 : f32
    %27 = vector.broadcast %cst_9 : f32 to vector<2x8xf32>
    %28 = arith.select %26, %23, %27 : vector<2x8xi1>, vector<2x8xf32>
    %cst_10 = arith.constant dense<0.000000e+00> : vector<8xf32>
    %29 = vector.multi_reduction <add>, %28, %cst_10 [0] : vector<2x8xf32> to vector<8xf32>
    %30 = vector.shape_cast %29 : vector<8xf32> to vector<1x8xf32>
    %c0_11 = arith.constant 0 : index
    %c0_12 = arith.constant 0 : index
    %31 = vector.load %arg4[%c0_11, %c0_12] : memref<1x8xf32, #tpu.memory_space<vmem>>, vector<1x8xf32>
    tpu.vector_store %arg4[%c0_11, %c0_12], %30 {strides = array<i32>} : memref<1x8xf32, #tpu.memory_space<vmem>>, vector<1x8xf32>,
    return
  }
  func.func @transform_0(%arg0: i32) -> (i32, i32) {
    %c0_i32 = arith.constant 0 : i32
    %c0_i32_0 = arith.constant 0 : i32
    return %c0_i32, %arg0 : i32, i32
  }
  func.func @transform_1(%arg0: i32) -> (i32, i32) {
    %c0_i32 = arith.constant 0 : i32
    %c0_i32_0 = arith.constant 0 : i32
    return %c0_i32, %arg0 : i32, i32
  }
  func.func @transform_2(%arg0: i32) -> (i32, i32) {
    %c0_i32 = arith.constant 0 : i32
    %c0_i32_0 = arith.constant 0 : i32
    return %c0_i32, %arg0 : i32, i32
  }
  func.func @transform_3(%arg0: i32) -> (i32, i32) {
    %c0_i32 = arith.constant 0 : i32
    %c0_i32_0 = arith.constant 0 : i32
    return %c0_i32, %arg0 : i32, i32
  }
}

</mosaic_0001>

<bundles_post_ra>
// kernel: tpu_custom_call.1
= control target key start
LH: loop header
LB: loop body
LE: loop exit
PB: predicated region body
PF: predicated region fallthrough
CT: control target
= control target key end

     0   :  { %9 = vsyncpa [#allocation3], 0  ;;  %s220_s0 = inlined_call_operand.hbm [shape: f32[2,8], index: 0, kind: input, shape index: {}]   ;;  %s221_s1 = inlined_call_operand.vmem [shape: f32[1,8], index: 1, kind: input, shape index: {}]   ;;  %s222_s2 = inlined_call_operand.hbm [shape: f32[1,8], index: 2, kind: output, shape index: {0}]   ;;  %s223_s3 = inlined_call_operand.hbm [shape: f32[1,8], index: 3, kind: output, shape index: {1}]  }
   0x1   :  { %10 = vsyncpa [#allocation4], 0 }
   0x2   :  { %11 = vsyncpa [#allocation7], 0  ;;  %s180_s12 = smov [#allocation2]  }
   0x3   :  { %s18_s13 = sshll.u32 %s180_s12, 4  ;;  %s19_s13 = int_to_ptr.vmem [resolvable:$true] %s18_s13 }
   0x4   :  { %s122_s14 = scalar_lea.vmem %s19_s13, 32  ;;  %p127_p1 = scmp.lt.s32.totalorder %s19_s13, %s19_s13 }
   0x5   :  { %p123_p0 = scmp.ne.s32.totalorder %s19_s13, %s122_s14  ;;  %p128_p2 = scmp.lt.s32.totalorder %s122_s14, %s122_s14 }
   0x7   :  { %p129_p3 = por %p128_p2, %p127_p1 }
   0x9   :  { %p130_p4 = pnand %p129_p3, %p123_p0 }
   0xb   :  { %133 = shalt.err (!%p130_p4)
}
   0xc   :  { %21 = dma.hbm_to_vmem [thread:$0]  %s220_s0, 32, %s19_s13, [#allocation3]  }
   0xd   :  { %174 = dma.done.wait [#allocation3], 32  }
   0xe   :  { %175 = vsyncadd [#allocation3], 4294967264  ;;  %v52_v0 = vlaneseq  ;;  %vm29_vm0 = vcmask 58368   ;;  %v27_v3 = vld [vmem:[#allocation2] sm:$0x3]  ;;  %s181_s0 = smov [#allocation6]  }
   0xf   :  { %v28_v4 = vld [vmem:[%s221_s1] sm:$0x1]  ;;  %v30_v5 = vsel %vm29_vm0, %v27_v3, -inf  ;;  %s94_s1 = sshll.u32 %s181_s0, 4  ;;  %vm49_vm2 = vcmask 57344   ;;  %s95_s1 = int_to_ptr.vmem [resolvable:$true] %s94_s1 }
  0x10   :  { %v53_v1 = vshrl.u32 %v52_v0, 7  ;;  %v51_v6 = vsub.f32 0.0, %v28_v4  ;;  %v31_v8 = vrot.slane %v30_v5, 4  ;;  %s134_s19 = scalar_lea.vmem %s95_s1, 16  ;;  %s138_s20 = scalar_lea.vmem %s95_s1, 32 }
  0x11   :  { %p135_p5 = scmp.ne.s32.totalorder %s95_s1, %s134_s19  ;;  %p139_p6 = scmp.lt.s32.totalorder %s95_s1, %s95_s1 }
  0x12   :  { %v54_v2 = vsub.s32 0, %v53_v1  ;;  %v32_v11 = vmax.f32 %v30_v5, %v31_v8  ;;  %vm68_vm1 = vcmp.ge.s32.totalorder %v53_v1, 1  ;;  %p140_p7 = scmp.lt.s32.totalorder %s138_s20, %s134_s19 }
  0x14   :  { %v55_v7 = vrot.slane %v27_v3, %v54_v2  ;;  %v61_v10 = vrot.slane %v51_v6, %v54_v2  ;;  %v33_v13 = vrot.slane %v32_v11, 2  ;;  %p141_p8 = por %p140_p7, %p139_p6 }
  0x16   :  { %v56_v9 = vsub.f32 %v55_v7, %v27_v3  ;;  %v34_v15 = vmax.f32 %v32_v11, %v33_v13  ;;  %p142_p9 = pnand %p141_p8, %p135_p5 }
  0x18   :  { %v63_v12 = vmul.f32 %v61_v10, %v56_v9  ;;  %v35_v17 = vrot.slane %v34_v15, 1 }
  0x1a   :  { %v64_v14 = vadd.f32 1.0, %v63_v12  ;;  %v36_v19 = vmax.f32 %v34_v15, %v35_v17 }
  0x1c   :  { %v65_v16 = vmax.f32 %v64_v14, 0.0  ;;  %v37_v22 = vsub.f32 %v27_v3, %v36_v19 }
  0x1e   :  { %v69_v18 = vsel %vm68_vm1, %v65_v16, 0.0  ;;  %v38_v24 = vmul.f32 1.442695, %v37_v22 }
  0x1f   :  { %v70_v20 = vsel %vm29_vm0, %v69_v18, 0.0 }
  0x20   :  { %v71_v21 = vrot.slane %v70_v20, 4  ;;  %110 = vpow2.f32 %v38_v24 }
  0x22   :  { %v72_v23 = vadd.f32 %v71_v21, %v70_v20 }
  0x24   :  { %v73_v25 = vrot.slane %v72_v23, 2 }
  0x26   :  { %v74_v26 = vadd.f32 %v73_v25, %v72_v23 }
  0x28   :  { %v75_v27 = vrot.slane %v74_v26, 1 }
  0x2a   :  { %v76_v28 = vadd.f32 %v75_v27, %v74_v26 }
  0x2c   :  { %77 = vst.msk [vmem:[#allocation6] sm:$0x1] %vm49_vm2, %v76_v28 }
  0x2d   :  { %145 = shalt.err (!%p142_p9)
}
  0x2e   :  { %97 = dma.vmem_to_hbm [thread:$0]  %s95_s1, 16, %s223_s3, [#allocation7]   ;;  %v111_v29 = vpop.eup %110 }
  0x2f   :  { %v40_v30 = vsel %vm29_vm0, %v111_v29, 0.0  ;;  %s182_s23 = smov [#allocation5]  }
  0x30   :  { %v41_v31 = vrot.slane %v40_v30, 4  ;;  %s84_s24 = sshll.u32 %s182_s23, 4  ;;  %s85_s24 = int_to_ptr.vmem [resolvable:$true] %s84_s24 }
  0x31   :  { %s154_s25 = scalar_lea.vmem %s85_s24, 16  ;;  %s158_s3 = scalar_lea.vmem %s85_s24, 32 }
  0x32   :  { %v42_v32 = vadd.f32 %v41_v31, %v40_v30  ;;  %p155_p10 = scmp.ne.s32.totalorder %s85_s24, %s154_s25  ;;  %p159_p11 = scmp.lt.s32.totalorder %s85_s24, %s85_s24 }
  0x33   :  { %p160_p12 = scmp.lt.s32.totalorder %s158_s3, %s154_s25 }
  0x34   :  { %v43_v33 = vrot.slane %v42_v32, 2 }
  0x35   :  { %p161_p13 = por %p160_p12, %p159_p11 }
  0x36   :  { %v44_v34 = vadd.f32 %v43_v33, %v42_v32 }
  0x37   :  { %p162_p0 = pnand %p161_p13, %p155_p10 }
  0x38   :  { %v45_v35 = vrot.slane %v44_v34, 1 }
  0x3a   :  { %v46_v36 = vadd.f32 %v45_v35, %v44_v34 }
  0x3c   :  { %112 = vrcp.f32 %v46_v36 }
  0x49   :  { %v113_v37 = vpop.eup %112 }
  0x4a   :  { %v48_v38 = vmul.f32 %v113_v37, %v111_v29 }
  0x4c   :  { %50 = vst.msk [vmem:[#allocation5] sm:$0x1] %vm49_vm2, %v48_v38 }
  0x4d   :  { %165 = shalt.err (!%p162_p0)
}
  0x4e   :  { %87 = dma.vmem_to_hbm [thread:$0]  %s85_s24, 16, %s222_s2, [#allocation4]  }
  0x4f   :  { %176 = dma.done.wait [#allocation4], 16  }
  0x50   :  { %177 = vsyncadd [#allocation4], 4294967280 }
  0x51   :  { %178 = dma.done.wait [#allocation7], 16  }
  0x52   :  { %179 = vsyncadd [#allocation7], 4294967280 }
  0x53   :  { %104 = vsyncpa [#allocation3], 1 }
  0x54   :  { %105 = vsyncpa [#allocation4], 1 }
  0x55   :  { %106 = vsyncpa [#allocation7], 1 }

</bundles_post_ra>
